<compile_context>
chip_gen: v6e
topology: v6e:2x2x1
jax: 0.10.0
libtpu: 0.0.40
codegen_flags: <defaults>
</compile_context>

<pallas_src>
import jax
import jax.numpy as jnp
from jax import lax
from jax.experimental import pallas as pl
from jax.experimental.pallas import tpu as pltpu

HIDDEN = 100     # nn.Linear(input_dim, 100)
OUT_DIM = 2
LANE = 128
SUBLANE = 8


def pu_fc2_kernel(x_ref, w1_ref, b1_ref, w2t_ref, b2t_ref, o_ref):
    # fc1 on the MXU: in-kernel f32->bf16 cast of the x tile, bf16 weights,
    # f32 accumulation.  bias + relu in f32.
    x_bf16 = x_ref[...].astype(jnp.bfloat16)                       # (TM, D)
    h = jnp.dot(x_bf16, w1_ref[...], preferred_element_type=jnp.float32)
    h = jnp.maximum(h + b1_ref[...], 0.0)                          # (TM, 128) f32

    # fc2 computed transposed so the output tile is lane-dense:
    #   out_t = w2^T @ h^T  via dot_general contracting the hidden (lane) axis
    # (same dimension numbers as q @ k^T in flash attention -> no materialized
    # transpose of h).  w2^T is zero-padded to 8 sublanes in the wrapper.
    out_t = lax.dot_general(
        w2t_ref[...], h.astype(jnp.bfloat16),
        dimension_numbers=(((1,), (1,)), ((), ())),
        preferred_element_type=jnp.float32)                        # (8, TM)
    out_t = out_t + b2t_ref[...]                                   # (8, TM)

    # original out[:, 1] = exp(out[:, 1])  ==  exp on row 1 of the transposed
    # layout.  Direct row stores (no iota/select); exp sits on the EUP slot.
    o_ref[0:1, :] = out_t[0:1, :].astype(o_ref.dtype)
    o_ref[1:2, :] = jnp.exp(out_t[1:2, :]).astype(o_ref.dtype)


def pu_fc2_forward(x, w1, b1, w2, b2, *, tile_bytes=4 << 20):
    """x: (N, input_dim) f32.  w1: (input_dim, 100), b1: (1, 100),
    w2: (100, 2), b2: (1, 2) (torch weights already transposed to in x out).
    Returns (N, 2) f32, matching pu_fc2.forward."""
    n, input_dim = x.shape
    hidden = w1.shape[1]
    out_dim = w2.shape[1]
    assert out_dim == OUT_DIM

    # --- one-time weight prep (tiny arrays; x itself is never copied) -------
    hidden_p = -(-hidden // LANE) * LANE                # 100 -> 128
    if hidden_p != hidden:
        pad = hidden_p - hidden
        w1 = jnp.pad(w1, ((0, 0), (0, pad)))            # zero columns
        b1 = jnp.pad(b1, ((0, 0), (0, pad)))            # zero lanes (relu(0)=0)
        w2 = jnp.pad(w2, ((0, pad), (0, 0)))            # zero rows
    # Transposed fc2 weights / bias, zero-padded 2 -> 8 sublanes.
    w2t = jnp.pad(w2.T, ((0, SUBLANE - out_dim), (0, 0)))          # (8, 128)
    b2t = jnp.pad(b2.T, ((0, SUBLANE - out_dim), (0, 0)))          # (8, 1)
    w1_bf16 = w1.astype(jnp.bfloat16)
    w2t_bf16 = w2t.astype(jnp.bfloat16)

    # --- row tile: ~tile_bytes of f32 x per grid step, multiple of 128, ------
    # --- keep >= 2 steps when possible (v7x two-TC sharding) -----------------
    tm_target = max(512, min(8192, tile_bytes // (4 * max(input_dim, 1))))
    tm_target = (tm_target // LANE) * LANE
    if n <= 2 * LANE:
        block_m = n                                     # single full-extent block
    else:
        half = max(LANE, (-(-n // 2)) // LANE * LANE)
        block_m = min(tm_target, half)
    grid = (pl.cdiv(n, block_m),)                       # partial last block OK

    # Explicit VMEM budget: double-buffered x tile + intermediates + weights.
    vmem_budget = (
        2 * block_m * input_dim * 4                     # x tile (f32, dbl-buffered)
        + block_m * input_dim * 2                       # in-kernel bf16 x copy
        + block_m * hidden_p * (4 + 2)                  # h (f32) + bf16 copy
        + 2 * out_dim * block_m * 4                     # (2, TM) out tile, dbl-buffered
        + 2 * (input_dim * hidden_p * 2 + hidden_p * 4
               + SUBLANE * hidden_p * 2 + SUBLANE * 4))
    vmem_limit = int(min(48 << 20, max(32 << 20, int(vmem_budget * 1.5))))

    out_t = pl.pallas_call(
        pu_fc2_kernel,
        out_shape=jax.ShapeDtypeStruct((out_dim, n), jnp.float32),
        grid=grid,
        in_specs=[
            pl.BlockSpec((block_m, input_dim), lambda i: (i, 0)),   # x tile (pipelined, f32)
            pl.BlockSpec((input_dim, hidden_p), lambda i: (0, 0)),  # w1 (resident, bf16)
            pl.BlockSpec((1, hidden_p), lambda i: (0, 0)),          # b1 (resident, f32)
            pl.BlockSpec((SUBLANE, hidden_p), lambda i: (0, 0)),    # w2^T (resident, bf16)
            pl.BlockSpec((SUBLANE, 1), lambda i: (0, 0)),           # b2^T (resident, f32)
        ],
        out_specs=pl.BlockSpec((out_dim, block_m), lambda i: (0, i)),
        compiler_params=pltpu.CompilerParams(
            dimension_semantics=("parallel",),
            vmem_limit_bytes=vmem_limit),
    )(x, w1_bf16, b1, w2t_bf16, b2t)

    # (2, N) -> (N, 2): tiny relative to the x stream.
    return out_t.T


def init_params(key, input_dim, hidden=HIDDEN, out_dim=OUT_DIM):
    # Deterministic init mimicking nn.Linear's uniform(-1/sqrt(fan_in), ...).
    k1, k2, k3, k4 = jax.random.split(key, 4)
    lim1 = 1.0 / jnp.sqrt(jnp.float32(input_dim))
    lim2 = 1.0 / jnp.sqrt(jnp.float32(hidden))
    w1 = jax.random.uniform(k1, (input_dim, hidden), jnp.float32, -lim1, lim1)
    b1 = jax.random.uniform(k2, (1, hidden), jnp.float32, -lim1, lim1)
    w2 = jax.random.uniform(k3, (hidden, out_dim), jnp.float32, -lim2, lim2)
    b2 = jax.random.uniform(k4, (1, out_dim), jnp.float32, -lim2, lim2)
    # NOTE: the module's extra `self.bias` parameter (1, 1) is unused in forward.
    return w1, b1, w2, b2


def reference_forward(x, w1, b1, w2, b2):
    h = jnp.maximum(x @ w1 + b1, 0.0)
    out = h @ w2 + b2
    return out.at[:, 1].set(jnp.exp(out[:, 1]))


def reference_forward_bf16_matmuls(x, w1, b1, w2, b2):
    # Same rounding points as the kernel (bf16 MXU inputs, f32 accumulation).
    h = jnp.dot(x.astype(jnp.bfloat16), w1.astype(jnp.bfloat16),
                preferred_element_type=jnp.float32)
    h = jnp.maximum(h + b1, 0.0)
    out = jnp.dot(h.astype(jnp.bfloat16), w2.astype(jnp.bfloat16),
                  preferred_element_type=jnp.float32) + b2
    return out.at[:, 1].set(jnp.exp(out[:, 1]))


if __name__ == "__main__":
    key = jax.random.PRNGKey(0)
    kx, kx2, kp = jax.random.split(key, 3)

    input_dim = 32
    w1, b1, w2, b2 = init_params(kp, input_dim)

    # Small single-block case.
    x = jax.random.normal(kx, (8, input_dim), jnp.float32)
    out = jax.block_until_ready(pu_fc2_forward(x, w1, b1, w2, b2))
    assert out.shape == (8, OUT_DIM)
    ref_bf16 = reference_forward_bf16_matmuls(x, w1, b1, w2, b2)
    assert jnp.allclose(out, ref_bf16, atol=1e-3, rtol=1e-3), \
        "mismatch (small) vs bf16-matched reference"
    ref_f32 = reference_forward(x, w1, b1, w2, b2)
    assert jnp.allclose(out, ref_f32, atol=5e-2, rtol=5e-2), \
        "mismatch (small) vs f32 reference"

    # Multi-step grid with a partial last block (exercises the lane-dense
    # (2, N) output path and the cdiv grid without any wrapper-side pad of x).
    x2 = jax.random.normal(kx2, (272, input_dim), jnp.float32)
    out2 = jax.block_until_ready(pu_fc2_forward(x2, w1, b1, w2, b2))
    assert out2.shape == (272, OUT_DIM)
    ref2 = reference_forward_bf16_matmuls(x2, w1, b1, w2, b2)
    assert jnp.allclose(out2, ref2, atol=1e-3, rtol=1e-3), \
        "mismatch (tiled) vs bf16-matched reference"

    print("KERNEL_OK")
</pallas_src>

<mosaic_0001>
module attributes {stable_mosaic.version = 11 : i64} {
  func.func @pu_fc2_kernel(%arg0: i32, %arg1: memref<8x32xf32, #tpu.memory_space<vmem>>, %arg2: memref<32x128xbf16, #tpu.memory_space<vmem>>, %arg3: memref<1x128xf32, #tpu.memory_space<vmem>>, %arg4: memref<8x128xbf16, #tpu.memory_space<vmem>>, %arg5: memref<8x1xf32, #tpu.memory_space<vmem>>, %arg6: memref<2x8xf32, #tpu.memory_space<vmem>>) attributes {dimension_semantics = [#tpu.dimension_semantics<parallel>], iteration_bounds = array<i64: 1>, scalar_prefetch = 0 : i64, scratch_operands = 0 : i64, tpu.core_type = #tpu.core_type<tc>, window_params = [{transform_indices = @transform_0, window_bounds = array<i64: 8, 32>}, {pipeline_mode = #tpu.pipeline_mode<synchronous>, transform_indices = @transform_1, window_bounds = array<i64: 32, 128>}, {pipeline_mode = #tpu.pipeline_mode<synchronous>, transform_indices = @transform_2, window_bounds = array<i64: 1, 128>}, {pipeline_mode = #tpu.pipeline_mode<synchronous>, transform_indices = @transform_3, window_bounds = array<i64: 8, 128>}, {pipeline_mode = #tpu.pipeline_mode<synchronous>, transform_indices = @transform_4, window_bounds = array<i64: 8, 1>}, {transform_indices = @transform_5, window_bounds = array<i64: 2, 8>}]} {
    %c0 = arith.constant 0 : index
    %c0_0 = arith.constant 0 : index
    %0 = vector.load %arg1[%c0, %c0_0] : memref<8x32xf32, #tpu.memory_space<vmem>>, vector<8x32xf32>
    %1 = arith.truncf %0 : vector<8x32xf32> to vector<8x32xbf16>
    %c0_1 = arith.constant 0 : index
    %c0_2 = arith.constant 0 : index
    %2 = vector.load %arg2[%c0_1, %c0_2] : memref<32x128xbf16, #tpu.memory_space<vmem>>, vector<32x128xbf16>
    %cst = arith.constant dense<0.000000e+00> : vector<8x128xf32>
    %3 = tpu.matmul %1, %2, %cst {dimension_numbers = #tpu.dot_dimension_numbers<[1], [0], [0], [1], [0, 0, 1, 1], [], []>} : vector<8x32xbf16>, vector<32x128xbf16>, vector<8x128xf32> -> vector<8x128xf32>
    %c0_3 = arith.constant 0 : index
    %c0_4 = arith.constant 0 : index
    %4 = vector.load %arg3[%c0_3, %c0_4] : memref<1x128xf32, #tpu.memory_space<vmem>>, vector<1x128xf32>
    %5 = vector.broadcast %4 : vector<1x128xf32> to vector<8x128xf32>
    %6 = arith.addf %3, %5 : vector<8x128xf32>
    %cst_5 = arith.constant 0.000000e+00 : f32
    %7 = vector.broadcast %cst_5 : f32 to vector<8x128xf32>
    %8 = arith.maximumf %6, %7 : vector<8x128xf32>
    %c0_6 = arith.constant 0 : index
    %c0_7 = arith.constant 0 : index
    %9 = vector.load %arg4[%c0_6, %c0_7] : memref<8x128xbf16, #tpu.memory_space<vmem>>, vector<8x128xbf16>
    %10 = arith.truncf %8 : vector<8x128xf32> to vector<8x128xbf16>
    %cst_8 = arith.constant dense<0.000000e+00> : vector<8x8xf32>
    %11 = tpu.matmul %9, %10, %cst_8 {dimension_numbers = #tpu.dot_dimension_numbers<[1], [1], [0], [0], [0, 0, 1, 0], [], []>} : vector<8x128xbf16>, vector<8x128xbf16>, vector<8x8xf32> -> vector<8x8xf32>
    %c0_9 = arith.constant 0 : index
    %c0_10 = arith.constant 0 : index
    %12 = vector.load %arg5[%c0_9, %c0_10] : memref<8x1xf32, #tpu.memory_space<vmem>>, vector<8x1xf32>
    %13 = vector.broadcast %12 : vector<8x1xf32> to vector<8x8xf32>
    %14 = arith.addf %11, %13 : vector<8x8xf32>
    %15 = vector.extract_strided_slice %14 {offsets = [0, 0], sizes = [1, 8], strides = [1, 1]} : vector<8x8xf32> to vector<1x8xf32>
    %c0_11 = arith.constant 0 : index
    %c0_12 = arith.constant 0 : index
    %16 = vector.load %arg6[%c0_11, %c0_12] : memref<2x8xf32, #tpu.memory_space<vmem>>, vector<1x8xf32>
    tpu.vector_store %arg6[%c0_11, %c0_12], %15 {strides = array<i32>} : memref<2x8xf32, #tpu.memory_space<vmem>>, vector<1x8xf32>,
    %17 = vector.extract_strided_slice %14 {offsets = [1, 0], sizes = [1, 8], strides = [1, 1]} : vector<8x8xf32> to vector<1x8xf32>
    %18 = math.exp %17 : vector<1x8xf32>
    %c1 = arith.constant 1 : index
    %c0_13 = arith.constant 0 : index
    %19 = vector.load %arg6[%c1, %c0_13] : memref<2x8xf32, #tpu.memory_space<vmem>>, vector<1x8xf32>
    tpu.vector_store %arg6[%c1, %c0_13], %18 {strides = array<i32>} : memref<2x8xf32, #tpu.memory_space<vmem>>, vector<1x8xf32>,
    return
  }
  func.func @transform_0(%arg0: i32) -> (i32, i32) {
    %c0_i32 = arith.constant 0 : i32
    %c0_i32_0 = arith.constant 0 : i32
    return %arg0, %c0_i32 : i32, i32
  }
  func.func @transform_1(%arg0: i32) -> (i32, i32) {
    %c0_i32 = arith.constant 0 : i32
    %c0_i32_0 = arith.constant 0 : i32
    %c0_i32_1 = arith.constant 0 : i32
    return %c0_i32, %c0_i32_0 : i32, i32
  }
  func.func @transform_2(%arg0: i32) -> (i32, i32) {
    %c0_i32 = arith.constant 0 : i32
    %c0_i32_0 = arith.constant 0 : i32
    %c0_i32_1 = arith.constant 0 : i32
    return %c0_i32, %c0_i32_0 : i32, i32
  }
  func.func @transform_3(%arg0: i32) -> (i32, i32) {
    %c0_i32 = arith.constant 0 : i32
    %c0_i32_0 = arith.constant 0 : i32
    %c0_i32_1 = arith.constant 0 : i32
    return %c0_i32, %c0_i32_0 : i32, i32
  }
  func.func @transform_4(%arg0: i32) -> (i32, i32) {
    %c0_i32 = arith.constant 0 : i32
    %c0_i32_0 = arith.constant 0 : i32
    %c0_i32_1 = arith.constant 0 : i32
    return %c0_i32, %c0_i32_0 : i32, i32
  }
  func.func @transform_5(%arg0: i32) -> (i32, i32) {
    %c0_i32 = arith.constant 0 : i32
    %c0_i32_0 = arith.constant 0 : i32
    return %c0_i32, %arg0 : i32, i32
  }
}

</mosaic_0001>

<bundles_post_ra>
// kernel: tpu_custom_call.1
= control target key start
LH: loop header
LB: loop body
LE: loop exit
PB: predicated region body
PF: predicated region fallthrough
CT: control target
= control target key end

     0   :  { %10 = vsyncpa [#allocation3], 0  ;;  %s346_s0 = inlined_call_operand.vmem [shape: f32[8,32], index: 0, kind: input, shape index: {}]   ;;  %s347_s1 = inlined_call_operand.hbm [shape: bf16[32,128], index: 1, kind: input, shape index: {}]   ;;  %s348_s2 = inlined_call_operand.hbm [shape: f32[1,128], index: 2, kind: input, shape index: {}]   ;;  %s349_s3 = inlined_call_operand.vmem [shape: bf16[8,128], index: 3, kind: input, shape index: {}]   ;;  %s350_s4 = inlined_call_operand.vmem [shape: f32[8,1], index: 4, kind: input, shape index: {}]   ;;  %s351_s5 = inlined_call_operand.hbm [shape: f32[2,8], index: 5, kind: output, shape index: {}]  }
   0x1   :  { %11 = vsyncpa [#allocation6], 0 }
   0x2   :  { %12 = vsyncpa [#allocation4], 0  ;;  %s290_s18 = smov [#allocation2]  }
   0x3   :  { %s20_s19 = sshll.u32 %s290_s18, 4  ;;  %s21_s19 = int_to_ptr.vmem [resolvable:$true] %s20_s19 }
   0x4   :  { %s232_s20 = scalar_lea.vmem %s21_s19, 256  ;;  %p237_p1 = scmp.lt.s32.totalorder %s21_s19, %s21_s19 }
   0x5   :  { %p233_p0 = scmp.ne.s32.totalorder %s21_s19, %s232_s20  ;;  %p238_p2 = scmp.lt.s32.totalorder %s232_s20, %s232_s20 }
   0x7   :  { %p239_p3 = por %p238_p2, %p237_p1 }
   0x9   :  { %p240_p4 = pnand %p239_p3, %p233_p0 }
   0xb   :  { %243 = shalt.err (!%p240_p4)
}
   0xc   :  { %s291_s21 = smov 64   ;;  %s292_s22 = smov 4  }
   0xd   :  { %26 = dma.hbm_to_vmem [thread:$0]  %s347_s1, 256, %s21_s19, [#allocation3], %s291_s21, %s291_s21, %s292_s22  }
   0xe   :  { %s293_s25 = smov [#allocation5]  }
   0xf   :  { %s33_s26 = sshll.u32 %s293_s25, 4  ;;  %s34_s26 = int_to_ptr.vmem [resolvable:$true] %s33_s26 }
  0x10   :  { %s252_s27 = scalar_lea.vmem %s34_s26, 16  ;;  %s256_s28 = scalar_lea.vmem %s34_s26, 32 }
  0x11   :  { %p253_p5 = scmp.ne.s32.totalorder %s34_s26, %s252_s27  ;;  %p257_p6 = scmp.lt.s32.totalorder %s34_s26, %s34_s26 }
  0x12   :  { %p258_p7 = scmp.lt.s32.totalorder %s256_s28, %s252_s27 }
  0x14   :  { %p259_p8 = por %p258_p7, %p257_p6 }
  0x16   :  { %p260_p9 = pnand %p259_p8, %p253_p5 }
  0x18   :  { %263 = shalt.err (!%p260_p9)
}
  0x19   :  { %36 = dma.hbm_to_vmem [thread:$0]  %s348_s2, 16, %s34_s26, [#allocation6]  }
  0x1a   :  { %284 = dma.done.wait [#allocation3], 256  }
  0x1b   :  { %285 = vsyncadd [#allocation3], 4294967040 }
  0x1c   :  { %286 = dma.done.wait [#allocation6], 16  }
  0x1d   :  { %287 = vsyncadd [#allocation6], 4294967280  ;;  %v294_v0 = vmov 0.0   ;;  %vm295_vm0 = vmmov 0   ;;  %v220_v1 = vld [vmem:[#allocation2 + $0x8] sm:$0xff]   ;;  %v221_v2 = vld [vmem:[#allocation2] sm:$0xff]  }
  0x1e   :  { %197 = vmatprep.subr.bf16.mxu0 %v294_v0  ;;  %201 = vmatprep.mubr.msk.bf16.mxu0 %vm295_vm0, %v294_v0  ;;  %v48_v3 = vld [vmem:[%s346_s0] sm:$0xff]  ;;  %vm73_vm1 = vcmask 261120   ;;  %v296_v6 = vmov 0   ;;  %v188_v7 = vld [vmem:[#allocation5] ss:$0 sm:$0xff]  ;;  %vm166_vm2 = vcmask 57344  }
  0x1f   :  { %205 = vmatprep.subr.bf16.mxu1 %v294_v0  ;;  %207 = vmatprep.mubr.msk.bf16.mxu1 %vm295_vm0, %v294_v0  ;;  %v49_v4 = vpack.c.bf16 %v48_v3, %v48_v3  ;;  %v120_v5 = vld [vmem:[%s350_s4] sm:$0xff]  ;;  %s297_s4 = smov [#allocation7]   ;;  %vm170_vm3 = vcmask 58369  }
  0x20   :  { %198 = vmatpush3.bf16.msra.mxu0 %v220_v1  ;;  %219 = vset.pattern.permute.xlu0 %v296_v6  ;;  %v118_v15 = vld [vmem:[%s349_s3] sm:$0xf]  ;;  %s178_s9 = sshll.u32 %s297_s4, 4  ;;  %s179_s9 = int_to_ptr.vmem [resolvable:$true] %s178_s9 }
  0x21   :  { %199 = vmatprep.subr.bf16.mxu0 %v294_v0  ;;  %123 = vperm.xlu0 %219, %v120_v5   ;;  %s264_s10 = scalar_lea.vmem %s179_s9, 32  ;;  %p269_p11 = scmp.lt.s32.totalorder %s179_s9, %s179_s9 }
  0x22   :  { %p265_p10 = scmp.ne.s32.totalorder %s179_s9, %s264_s10  ;;  %p270_p12 = scmp.lt.s32.totalorder %s264_s10, %s264_s10 }
  0x24   :  { %200 = vmatpush3.bf16.msra.mxu0 %v221_v2  ;;  %p271_p13 = por %p270_p12, %p269_p11 }
  0x26   :  { %p272_p0 = pnand %p271_p13, %p265_p10 }
  0x27   :  { %202 = vmatmul.mubr.msk.bf16.vlgmr.msra.gmra.mxu0 %vm73_vm1, %v49_v4 }
  0x9c   :  { %v124_v16 = vpop.permute.xlu0 %123 }
  0xe7   :  { %v111_v8 = vpop.f32.mrf.mxu0 }
  0xe8   :  { %v112_v9 = vadd.f32 %v188_v7, %v111_v8 }
  0xe9   :  { %v203_v10 = vpop.f32.mrf.mxu0 }
  0xea   :  { %v117_v11 = vmax.f32 %v112_v9, 0.0 }
  0xeb   :  { %v114_v12 = vpop.f32.mrf.mxu0 }
  0xec   :  { %v119_v13 = vpack.c.bf16 %v117_v11, %v117_v11 }
  0xed   :  { %v204_v14 = vpop.f32.mrf.mxu0 }
  0xee   :  { %206 = vmatpush3.bf16.xpose.msra.mxu1 %v119_v13 }
  0xf5   :  { %208 = vmatmul.mubr.bf16.vlgmr.msra.gmra.mxu1 %v118_v15 }
 0x1b5   :  { %v160_v17 = vpop.f32.mrf.mxu1 }
 0x1b6   :  { %v161_v18 = vadd.f32 %v160_v17, %v124_v16 }
 0x1b7   :  { %v209_v19 = vpop.f32.mrf.mxu1 }
 0x1b8   :  { %v168_v20 = vmul.f32 1.442695, %v161_v18  ;;  %167 = vst.msk [vmem:[#allocation7] sm:$0x1] %vm166_vm2, %v161_v18 }
 0x1b9   :  { %v163_v21 = vpop.f32.mrf.mxu1 }
 0x1ba   :  { %222 = vpow2.f32 %v168_v20 }
 0x1bb   :  { %v210_v22 = vpop.f32.mrf.mxu1 }
 0x1c7   :  { %v223_v23 = vpop.eup %222 }
 0x1c8   :  { %171 = vst.msk [vmem:[#allocation7] sm:$0x2] %vm170_vm3, %v223_v23 }
 0x1c9   :  { %275 = shalt.err (!%p272_p0)
}
 0x1ca   :  { %181 = dma.vmem_to_hbm [thread:$0]  %s179_s9, 32, %s351_s5, [#allocation4]  }
 0x1cb   :  { %288 = dma.done.wait [#allocation4], 32  }
 0x1cc   :  { %289 = vsyncadd [#allocation4], 4294967264 }
 0x1cd   :  { %185 = vsyncpa [#allocation3], 1 }
 0x1ce   :  { %186 = vsyncpa [#allocation6], 1 }
 0x1cf   :  { %187 = vsyncpa [#allocation4], 1 }

</bundles_post_ra>
